<compile_context>
chip_gen: v7x
topology: tpu7x:2x2x1
jax: 0.10.0
libtpu: 0.0.40
codegen_flags: <defaults>
</compile_context>

<pallas_src>
import functools

import numpy as np
import jax
import jax.numpy as jnp
from jax.experimental import pallas as pl
from jax.experimental.pallas import tpu as pltpu

NEG_SLOPE = 0.01   # nn.LeakyReLU default
LANES = 128        # padded flattened spatial width (one full vreg lane row)


# ----------------------------------------------------------------------------
# Fused Pallas kernel: all six layers, activations resident on-chip as (C, 128).
# ----------------------------------------------------------------------------
def _siamies_kernel(p1_ref, w_ref, b_ref, o_ref, *, wc, h3):
    f32 = jnp.float32

    def lrelu(v):
        return jnp.where(v >= 0.0, v, NEG_SLOPE * v)

    lane = jax.lax.broadcasted_iota(jnp.int32, (1, LANES), 1)

    def stack3(a, transposed):
        # Conv      taps read a[:, j + wc*t] -> roll left  by wc*t (shift -wc*t).
        # ConvTrans taps read a[:, j - wc*t] -> roll right by wc*t (shift +wc*t).
        # Rolls run on the XLU; taps are stacked on sublanes for one wide dot.
        s = wc if transposed else (LANES - wc) % LANES
        return jnp.concatenate(
            [a, pltpu.roll(a, s, 1), pltpu.roll(a, (2 * s) % LANES, 1)], axis=0)

    # L1: Conv2d(1->4, 3x3, stride (3,1)) on pre-built, zero-padded im2col patches.
    a = lrelu(jnp.dot(w_ref[0:4, 0:9], p1_ref[0], preferred_element_type=f32)
              + b_ref[0:4, :])                                           # (4, 128)
    # L2: Conv2d(4->8, (3,1))
    a = lrelu(jnp.dot(w_ref[8:16, 0:12], stack3(a, False),
                      preferred_element_type=f32) + b_ref[8:16, :])      # (8, 128)
    # L3: Conv2d(8->16, (3,1)); zero invalid lanes before the deconv rolls.
    a = lrelu(jnp.dot(w_ref[16:32, 0:24], stack3(a, False),
                      preferred_element_type=f32) + b_ref[16:32, :])
    a = jnp.where(lane < h3 * wc, a, 0.0)                                # (16, 128)
    # L4: ConvTranspose2d(16->8, (3,1))
    a = lrelu(jnp.dot(w_ref[32:40, 0:48], stack3(a, True),
                      preferred_element_type=f32) + b_ref[32:40, :])
    a = jnp.where(lane < (h3 + 2) * wc, a, 0.0)                          # (8, 128)
    # L5: ConvTranspose2d(8->4, (3,1))
    a = lrelu(jnp.dot(w_ref[40:44, 0:24], stack3(a, True),
                      preferred_element_type=f32) + b_ref[40:44, :])     # (4, 128)
    # L6: ConvTranspose2d(4->1, (2,1), stride (2,1)) -> even/odd output-row phases.
    o_ref[0] = lrelu(jnp.dot(w_ref[48:50, 0:4], a, preferred_element_type=f32)
                     + b_ref[48:50, :])                                  # (2, 128)


# ----------------------------------------------------------------------------
# Forward wrapper: one pallas_call for everything.
# ----------------------------------------------------------------------------
def siamies_forward(params, x):
    n, c, h, w = x.shape
    assert c == 1 and w >= 3 and h >= 15
    wc = w - 2                        # width after the 3-wide conv1 kernel
    h1 = (h - 3) // 3 + 1             # conv1 output height (== final height / 2)
    h3 = h1 - 4                       # conv3 output height
    L = h1 * wc                       # valid flattened spatial width
    assert h3 >= 1 and L <= LANES, "flattened spatial extent must fit 128 lanes"

    # conv1 im2col (the only wrapper-side marshalling), zero-padded to 128 lanes.
    # TODO(synk): could be moved in-kernel, but it needs (h1,wc)->lane relayouts
    # that are not worth the risk at these sizes.
    xr = x[:, 0, :3 * h1, :].reshape(n, h1, 3, w)
    cols = [xr[:, :, dh, dw:dw + wc] for dh in range(3) for dw in range(3)]
    p1 = jnp.stack(cols, axis=1).reshape(n, 9, L)
    p1 = jnp.pad(p1, ((0, 0), (0, 0), (0, LANES - L)))

    # Pre-reshape weights into (Cout, taps*Cin) matmul form and pack everything
    # into two small slabs with 8-row-aligned sub-blocks (static in-kernel slices).
    w1m = params["w1"].reshape(4, 9)                                    # (cout, dh*3+dw)
    w2m = params["w2"][:, :, :, 0].transpose(0, 2, 1).reshape(8, 12)    # (cout, dh*Cin+cin)
    w3m = params["w3"][:, :, :, 0].transpose(0, 2, 1).reshape(16, 24)
    t1m = params["wt1"][:, :, :, 0].transpose(1, 2, 0).reshape(8, 48)   # (cout, k*Cin+cin)
    t2m = params["wt2"][:, :, :, 0].transpose(1, 2, 0).reshape(4, 24)
    t3m = params["wt3"][:, 0, :, 0].T                                   # (phase k, cin)

    wpack = jnp.zeros((56, 48), jnp.float32)
    wpack = wpack.at[0:4, 0:9].set(w1m)
    wpack = wpack.at[8:16, 0:12].set(w2m)
    wpack = wpack.at[16:32, 0:24].set(w3m)
    wpack = wpack.at[32:40, 0:48].set(t1m)
    wpack = wpack.at[40:44, 0:24].set(t2m)
    wpack = wpack.at[48:50, 0:4].set(t3m)

    bpack = jnp.zeros((56, 1), jnp.float32)
    bpack = bpack.at[0:4, 0].set(params["b1"])
    bpack = bpack.at[8:16, 0].set(params["b2"])
    bpack = bpack.at[16:32, 0].set(params["b3"])
    bpack = bpack.at[32:40, 0].set(params["bt1"])
    bpack = bpack.at[40:44, 0].set(params["bt2"])
    bpack = bpack.at[48:50, 0].set(jnp.broadcast_to(params["bt3"], (2,)))

    kernel = functools.partial(_siamies_kernel, wc=wc, h3=h3)
    out_k = pl.pallas_call(
        kernel,
        out_shape=jax.ShapeDtypeStruct((n, 2, LANES), jnp.float32),
        grid=(n,),
        in_specs=[
            pl.BlockSpec((1, 9, LANES), lambda i: (i, 0, 0)),
            pl.BlockSpec((56, 48), lambda i: (0, 0)),
            pl.BlockSpec((56, 1), lambda i: (0, 0)),
        ],
        out_specs=pl.BlockSpec((1, 2, LANES), lambda i: (i, 0, 0)),
        compiler_params=pltpu.CompilerParams(dimension_semantics=("parallel",)),
    )(p1, wpack, bpack)

    # Interleave the two sub-pixel phases into output rows: oh = 2*ih + phase.
    out = out_k[:, :, :L].reshape(n, 2, h1, wc).transpose(0, 2, 1, 3)
    return out.reshape(n, 1, 2 * h1, wc)


# ----------------------------------------------------------------------------
# Deterministic parameter initialization (synthetic, matching module shapes)
# ----------------------------------------------------------------------------
def init_params(key):
    def u(k, shape, fan_in):
        bound = 1.0 / jnp.sqrt(jnp.float32(fan_in))
        return jax.random.uniform(k, shape, jnp.float32, -bound, bound)

    ks = jax.random.split(key, 12)
    p = {}
    # Conv2d weights: (Cout, Cin, kh, kw)
    p["w1"], p["b1"] = u(ks[0], (4, 1, 3, 3), 1 * 9),  u(ks[1], (4,), 1 * 9)
    p["w2"], p["b2"] = u(ks[2], (8, 4, 3, 1), 4 * 3),  u(ks[3], (8,), 4 * 3)
    p["w3"], p["b3"] = u(ks[4], (16, 8, 3, 1), 8 * 3), u(ks[5], (16,), 8 * 3)
    # ConvTranspose2d weights: (Cin, Cout, kh, kw)
    p["wt1"], p["bt1"] = u(ks[6], (16, 8, 3, 1), 16 * 3), u(ks[7], (8,), 16 * 3)
    p["wt2"], p["bt2"] = u(ks[8], (8, 4, 3, 1), 8 * 3),   u(ks[9], (4,), 8 * 3)
    p["wt3"], p["bt3"] = u(ks[10], (4, 1, 2, 1), 4 * 2),  u(ks[11], (1,), 4 * 2)
    return p


# ----------------------------------------------------------------------------
# Pure-JAX reference (lax convolutions) for the correctness check.
# ----------------------------------------------------------------------------
def _ref_forward(params, x):
    hi = jax.lax.Precision.HIGHEST

    def lrelu(v):
        return jnp.where(v >= 0.0, v, NEG_SLOPE * v)

    def conv(y, wgt, bias, stride):
        dn = jax.lax.conv_dimension_numbers(y.shape, wgt.shape, ("NCHW", "OIHW", "NCHW"))
        o = jax.lax.conv_general_dilated(y, wgt, window_strides=stride, padding="VALID",
                                         dimension_numbers=dn, precision=hi)
        return o + bias.reshape(1, -1, 1, 1)

    def convT(y, wgt, bias, stride):
        wf = jnp.flip(wgt, (2, 3)).transpose(1, 0, 2, 3)   # (Cout, Cin, kh, kw)
        kh, kw = wf.shape[2], wf.shape[3]
        dn = jax.lax.conv_dimension_numbers(y.shape, wf.shape, ("NCHW", "OIHW", "NCHW"))
        o = jax.lax.conv_general_dilated(
            y, wf, window_strides=(1, 1),
            padding=((kh - 1, kh - 1), (kw - 1, kw - 1)),
            lhs_dilation=stride, dimension_numbers=dn, precision=hi)
        return o + bias.reshape(1, -1, 1, 1)

    out = lrelu(conv(x, params["w1"], params["b1"], (3, 1)))
    out = lrelu(conv(out, params["w2"], params["b2"], (1, 1)))
    out = lrelu(conv(out, params["w3"], params["b3"], (1, 1)))
    out = lrelu(convT(out, params["wt1"], params["bt1"], (1, 1)))
    out = lrelu(convT(out, params["wt2"], params["bt2"], (1, 1)))
    out = lrelu(convT(out, params["wt3"], params["bt3"], (2, 1)))
    return out


if __name__ == "__main__":
    key = jax.random.PRNGKey(0)
    k_param, k_x = jax.random.split(key)
    params = init_params(k_param)

    # Input NCHW: batch=2, channels=1, H=18 (stride-3 conv), W=16.
    x = jax.random.normal(k_x, (2, 1, 18, 16), jnp.float32)

    fwd = jax.jit(functools.partial(siamies_forward, params))
    out = fwd(x)
    jax.block_until_ready(out)

    # Shape trace: (2,1,18,16)->(2,4,6,14)->(2,8,4,14)->(2,16,2,14)
    #              ->(2,8,4,14)->(2,4,6,14)->(2,1,12,14)
    assert out.shape == (2, 1, 12, 14), out.shape
    assert out.dtype == jnp.float32

    ref = _ref_forward(params, x)
    np.testing.assert_allclose(np.asarray(out), np.asarray(ref), rtol=1e-1, atol=2e-3)

    print("KERNEL_OK")
</pallas_src>

<mosaic_0001>
module attributes {stable_mosaic.version = 11 : i64} {
  func.func @_siamies_kernel(%arg0: i32, %arg1: memref<1x9x128xf32, #tpu.memory_space<vmem>>, %arg2: memref<56x48xf32, #tpu.memory_space<vmem>>, %arg3: memref<56x1xf32, #tpu.memory_space<vmem>>, %arg4: memref<1x2x128xf32, #tpu.memory_space<vmem>>) attributes {dimension_semantics = [#tpu.dimension_semantics<parallel>], iteration_bounds = array<i64: 2>, scalar_prefetch = 0 : i64, scratch_operands = 0 : i64, tpu.core_type = #tpu.core_type<tc>, window_params = [{transform_indices = @transform_0, window_bounds = array<i64: 1, 9, 128>}, {pipeline_mode = #tpu.pipeline_mode<synchronous>, transform_indices = @transform_1, window_bounds = array<i64: 56, 48>}, {pipeline_mode = #tpu.pipeline_mode<synchronous>, transform_indices = @transform_2, window_bounds = array<i64: 56, 1>}, {transform_indices = @transform_3, window_bounds = array<i64: 1, 2, 128>}]} {
    %0 = tpu.iota {dimensions = array<i32: 1>} : vector<1x128xi32>
    %c0 = arith.constant 0 : index
    %c0_0 = arith.constant 0 : index
    %1 = vector.load %arg2[%c0, %c0_0] : memref<56x48xf32, #tpu.memory_space<vmem>>, vector<4x9xf32>
    %c0_1 = arith.constant 0 : index
    %c0_2 = arith.constant 0 : index
    %c0_3 = arith.constant 0 : index
    %2 = vector.load %arg1[%c0_1, %c0_2, %c0_3] : memref<1x9x128xf32, #tpu.memory_space<vmem>>, vector<1x9x128xf32>
    %3 = vector.shape_cast %2 : vector<1x9x128xf32> to vector<9x128xf32>
    %cst = arith.constant dense<0.000000e+00> : vector<4x128xf32>
    %4 = tpu.matmul %1, %3, %cst {dimension_numbers = #tpu.dot_dimension_numbers<[1], [0], [0], [1], [0, 0, 1, 1], [], []>} : vector<4x9xf32>, vector<9x128xf32>, vector<4x128xf32> -> vector<4x128xf32>
    %c0_4 = arith.constant 0 : index
    %c0_5 = arith.constant 0 : index
    %5 = vector.load %arg3[%c0_4, %c0_5] : memref<56x1xf32, #tpu.memory_space<vmem>>, vector<4x1xf32>
    %6 = vector.broadcast %5 : vector<4x1xf32> to vector<4x128xf32>
    %7 = arith.addf %4, %6 : vector<4x128xf32>
    %cst_6 = arith.constant 0.000000e+00 : f32
    %8 = vector.broadcast %cst_6 : f32 to vector<4x128xf32>
    %9 = arith.cmpf oge, %7, %8 : vector<4x128xf32>
    %cst_7 = arith.constant 0.00999999977 : f32
    %10 = vector.broadcast %cst_7 : f32 to vector<4x128xf32>
    %11 = arith.mulf %10, %7 : vector<4x128xf32>
    %12 = arith.select %9, %7, %11 : vector<4x128xi1>, vector<4x128xf32>
    %c8 = arith.constant 8 : index
    %c0_8 = arith.constant 0 : index
    %13 = vector.load %arg2[%c8, %c0_8] : memref<56x48xf32, #tpu.memory_space<vmem>>, vector<8x12xf32>
    %c114_i32 = arith.constant 114 : i32
    %14 = tpu.dynamic_rotate %12 by %c114_i32 dim 1 : vector<4x128xf32>, i32 -> vector<4x128xf32>
    %c100_i32 = arith.constant 100 : i32
    %15 = tpu.dynamic_rotate %12 by %c100_i32 dim 1 : vector<4x128xf32>, i32 -> vector<4x128xf32>
    %16 = tpu.concatenate %12, %14, %15 in 0 : vector<4x128xf32>, vector<4x128xf32>, vector<4x128xf32> -> vector<12x128xf32>
    %cst_9 = arith.constant dense<0.000000e+00> : vector<8x128xf32>
    %17 = tpu.matmul %13, %16, %cst_9 {dimension_numbers = #tpu.dot_dimension_numbers<[1], [0], [0], [1], [0, 0, 1, 1], [], []>} : vector<8x12xf32>, vector<12x128xf32>, vector<8x128xf32> -> vector<8x128xf32>
    %c8_10 = arith.constant 8 : index
    %c0_11 = arith.constant 0 : index
    %18 = vector.load %arg3[%c8_10, %c0_11] : memref<56x1xf32, #tpu.memory_space<vmem>>, vector<8x1xf32>
    %19 = vector.broadcast %18 : vector<8x1xf32> to vector<8x128xf32>
    %20 = arith.addf %17, %19 : vector<8x128xf32>
    %cst_12 = arith.constant 0.000000e+00 : f32
    %21 = vector.broadcast %cst_12 : f32 to vector<8x128xf32>
    %22 = arith.cmpf oge, %20, %21 : vector<8x128xf32>
    %cst_13 = arith.constant 0.00999999977 : f32
    %23 = vector.broadcast %cst_13 : f32 to vector<8x128xf32>
    %24 = arith.mulf %23, %20 : vector<8x128xf32>
    %25 = arith.select %22, %20, %24 : vector<8x128xi1>, vector<8x128xf32>
    %c16 = arith.constant 16 : index
    %c0_14 = arith.constant 0 : index
    %26 = vector.load %arg2[%c16, %c0_14] : memref<56x48xf32, #tpu.memory_space<vmem>>, vector<16x24xf32>
    %c114_i32_15 = arith.constant 114 : i32
    %27 = tpu.dynamic_rotate %25 by %c114_i32_15 dim 1 : vector<8x128xf32>, i32 -> vector<8x128xf32>
    %c100_i32_16 = arith.constant 100 : i32
    %28 = tpu.dynamic_rotate %25 by %c100_i32_16 dim 1 : vector<8x128xf32>, i32 -> vector<8x128xf32>
    %29 = tpu.concatenate %25, %27, %28 in 0 : vector<8x128xf32>, vector<8x128xf32>, vector<8x128xf32> -> vector<24x128xf32>
    %cst_17 = arith.constant dense<0.000000e+00> : vector<16x128xf32>
    %30 = tpu.matmul %26, %29, %cst_17 {dimension_numbers = #tpu.dot_dimension_numbers<[1], [0], [0], [1], [0, 0, 1, 1], [], []>} : vector<16x24xf32>, vector<24x128xf32>, vector<16x128xf32> -> vector<16x128xf32>
    %c16_18 = arith.constant 16 : index
    %c0_19 = arith.constant 0 : index
    %31 = vector.load %arg3[%c16_18, %c0_19] : memref<56x1xf32, #tpu.memory_space<vmem>>, vector<16x1xf32>
    %32 = vector.broadcast %31 : vector<16x1xf32> to vector<16x128xf32>
    %33 = arith.addf %30, %32 : vector<16x128xf32>
    %cst_20 = arith.constant 0.000000e+00 : f32
    %34 = vector.broadcast %cst_20 : f32 to vector<16x128xf32>
    %35 = arith.cmpf oge, %33, %34 : vector<16x128xf32>
    %cst_21 = arith.constant 0.00999999977 : f32
    %36 = vector.broadcast %cst_21 : f32 to vector<16x128xf32>
    %37 = arith.mulf %36, %33 : vector<16x128xf32>
    %38 = arith.select %35, %33, %37 : vector<16x128xi1>, vector<16x128xf32>
    %c28_i32 = arith.constant 28 : i32
    %39 = vector.broadcast %c28_i32 : i32 to vector<1x128xi32>
    %40 = arith.cmpi slt, %0, %39 : vector<1x128xi32>
    %cst_22 = arith.constant 0.000000e+00 : f32
    %41 = vector.shape_cast %40 : vector<1x128xi1> to vector<1x128xi1>
    %42 = vector.broadcast %41 : vector<1x128xi1> to vector<16x128xi1>
    %43 = vector.broadcast %cst_22 : f32 to vector<16x128xf32>
    %44 = arith.select %42, %38, %43 : vector<16x128xi1>, vector<16x128xf32>
    %c32 = arith.constant 32 : index
    %c0_23 = arith.constant 0 : index
    %45 = vector.load %arg2[%c32, %c0_23] : memref<56x48xf32, #tpu.memory_space<vmem>>, vector<8x48xf32>
    %c14_i32 = arith.constant 14 : i32
    %46 = tpu.dynamic_rotate %44 by %c14_i32 dim 1 : vector<16x128xf32>, i32 -> vector<16x128xf32>
    %c28_i32_24 = arith.constant 28 : i32
    %47 = tpu.dynamic_rotate %44 by %c28_i32_24 dim 1 : vector<16x128xf32>, i32 -> vector<16x128xf32>
    %48 = tpu.concatenate %44, %46, %47 in 0 : vector<16x128xf32>, vector<16x128xf32>, vector<16x128xf32> -> vector<48x128xf32>
    %cst_25 = arith.constant dense<0.000000e+00> : vector<8x128xf32>
    %49 = tpu.matmul %45, %48, %cst_25 {dimension_numbers = #tpu.dot_dimension_numbers<[1], [0], [0], [1], [0, 0, 1, 1], [], []>} : vector<8x48xf32>, vector<48x128xf32>, vector<8x128xf32> -> vector<8x128xf32>
    %c32_26 = arith.constant 32 : index
    %c0_27 = arith.constant 0 : index
    %50 = vector.load %arg3[%c32_26, %c0_27] : memref<56x1xf32, #tpu.memory_space<vmem>>, vector<8x1xf32>
    %51 = vector.broadcast %50 : vector<8x1xf32> to vector<8x128xf32>
    %52 = arith.addf %49, %51 : vector<8x128xf32>
    %cst_28 = arith.constant 0.000000e+00 : f32
    %53 = vector.broadcast %cst_28 : f32 to vector<8x128xf32>
    %54 = arith.cmpf oge, %52, %53 : vector<8x128xf32>
    %cst_29 = arith.constant 0.00999999977 : f32
    %55 = vector.broadcast %cst_29 : f32 to vector<8x128xf32>
    %56 = arith.mulf %55, %52 : vector<8x128xf32>
    %57 = arith.select %54, %52, %56 : vector<8x128xi1>, vector<8x128xf32>
    %c56_i32 = arith.constant 56 : i32
    %58 = vector.broadcast %c56_i32 : i32 to vector<1x128xi32>
    %59 = arith.cmpi slt, %0, %58 : vector<1x128xi32>
    %cst_30 = arith.constant 0.000000e+00 : f32
    %60 = vector.shape_cast %59 : vector<1x128xi1> to vector<1x128xi1>
    %61 = vector.broadcast %60 : vector<1x128xi1> to vector<8x128xi1>
    %62 = vector.broadcast %cst_30 : f32 to vector<8x128xf32>
    %63 = arith.select %61, %57, %62 : vector<8x128xi1>, vector<8x128xf32>
    %c40 = arith.constant 40 : index
    %c0_31 = arith.constant 0 : index
    %64 = vector.load %arg2[%c40, %c0_31] : memref<56x48xf32, #tpu.memory_space<vmem>>, vector<4x24xf32>
    %c14_i32_32 = arith.constant 14 : i32
    %65 = tpu.dynamic_rotate %63 by %c14_i32_32 dim 1 : vector<8x128xf32>, i32 -> vector<8x128xf32>
    %c28_i32_33 = arith.constant 28 : i32
    %66 = tpu.dynamic_rotate %63 by %c28_i32_33 dim 1 : vector<8x128xf32>, i32 -> vector<8x128xf32>
    %67 = tpu.concatenate %63, %65, %66 in 0 : vector<8x128xf32>, vector<8x128xf32>, vector<8x128xf32> -> vector<24x128xf32>
    %cst_34 = arith.constant dense<0.000000e+00> : vector<4x128xf32>
    %68 = tpu.matmul %64, %67, %cst_34 {dimension_numbers = #tpu.dot_dimension_numbers<[1], [0], [0], [1], [0, 0, 1, 1], [], []>} : vector<4x24xf32>, vector<24x128xf32>, vector<4x128xf32> -> vector<4x128xf32>
    %c40_35 = arith.constant 40 : index
    %c0_36 = arith.constant 0 : index
    %69 = vector.load %arg3[%c40_35, %c0_36] : memref<56x1xf32, #tpu.memory_space<vmem>>, vector<4x1xf32>
    %70 = vector.broadcast %69 : vector<4x1xf32> to vector<4x128xf32>
    %71 = arith.addf %68, %70 : vector<4x128xf32>
    %cst_37 = arith.constant 0.000000e+00 : f32
    %72 = vector.broadcast %cst_37 : f32 to vector<4x128xf32>
    %73 = arith.cmpf oge, %71, %72 : vector<4x128xf32>
    %cst_38 = arith.constant 0.00999999977 : f32
    %74 = vector.broadcast %cst_38 : f32 to vector<4x128xf32>
    %75 = arith.mulf %74, %71 : vector<4x128xf32>
    %76 = arith.select %73, %71, %75 : vector<4x128xi1>, vector<4x128xf32>
    %c48 = arith.constant 48 : index
    %c0_39 = arith.constant 0 : index
    %77 = vector.load %arg2[%c48, %c0_39] : memref<56x48xf32, #tpu.memory_space<vmem>>, vector<2x4xf32>
    %cst_40 = arith.constant dense<0.000000e+00> : vector<2x128xf32>
    %78 = tpu.matmul %77, %76, %cst_40 {dimension_numbers = #tpu.dot_dimension_numbers<[1], [0], [0], [1], [0, 0, 1, 1], [], []>} : vector<2x4xf32>, vector<4x128xf32>, vector<2x128xf32> -> vector<2x128xf32>
    %c48_41 = arith.constant 48 : index
    %c0_42 = arith.constant 0 : index
    %79 = vector.load %arg3[%c48_41, %c0_42] : memref<56x1xf32, #tpu.memory_space<vmem>>, vector<2x1xf32>
    %80 = vector.broadcast %79 : vector<2x1xf32> to vector<2x128xf32>
    %81 = arith.addf %78, %80 : vector<2x128xf32>
    %cst_43 = arith.constant 0.000000e+00 : f32
    %82 = vector.broadcast %cst_43 : f32 to vector<2x128xf32>
    %83 = arith.cmpf oge, %81, %82 : vector<2x128xf32>
    %cst_44 = arith.constant 0.00999999977 : f32
    %84 = vector.broadcast %cst_44 : f32 to vector<2x128xf32>
    %85 = arith.mulf %84, %81 : vector<2x128xf32>
    %86 = arith.select %83, %81, %85 : vector<2x128xi1>, vector<2x128xf32>
    %c0_45 = arith.constant 0 : index
    %c0_46 = arith.constant 0 : index
    %c0_47 = arith.constant 0 : index
    %87 = vector.load %arg4[%c0_45, %c0_46, %c0_47] : memref<1x2x128xf32, #tpu.memory_space<vmem>>, vector<1x2x128xf32>
    %88 = vector.shape_cast %87 : vector<1x2x128xf32> to vector<2x128xf32>
    %89 = vector.shape_cast %86 : vector<2x128xf32> to vector<1x2x128xf32>
    tpu.vector_store %arg4[%c0_45, %c0_46, %c0_47], %89 {strides = array<i32>} : memref<1x2x128xf32, #tpu.memory_space<vmem>>, vector<1x2x128xf32>,
    return
  }
  func.func @transform_0(%arg0: i32) -> (i32, i32, i32) {
    %c0_i32 = arith.constant 0 : i32
    %c0_i32_0 = arith.constant 0 : i32
    %c0_i32_1 = arith.constant 0 : i32
    return %arg0, %c0_i32, %c0_i32_0 : i32, i32, i32
  }
  func.func @transform_1(%arg0: i32) -> (i32, i32) {
    %c0_i32 = arith.constant 0 : i32
    %c0_i32_0 = arith.constant 0 : i32
    %c0_i32_1 = arith.constant 0 : i32
    return %c0_i32, %c0_i32_0 : i32, i32
  }
  func.func @transform_2(%arg0: i32) -> (i32, i32) {
    %c0_i32 = arith.constant 0 : i32
    %c0_i32_0 = arith.constant 0 : i32
    %c0_i32_1 = arith.constant 0 : i32
    return %c0_i32, %c0_i32_0 : i32, i32
  }
  func.func @transform_3(%arg0: i32) -> (i32, i32, i32) {
    %c0_i32 = arith.constant 0 : i32
    %c0_i32_0 = arith.constant 0 : i32
    %c0_i32_1 = arith.constant 0 : i32
    return %arg0, %c0_i32, %c0_i32_0 : i32, i32, i32
  }
}

</mosaic_0001>

<bundles_post_ra>
// kernel: siamies_forward.1
= control target key start
LH: loop header
LB: loop body
LE: loop exit
PB: predicated region body
PF: predicated region fallthrough
CT: control target
= control target key end

     0   :  { %s984_s12 = smov 0   ;;  %s1074_s0 = inlined_call_operand.vmem [shape: f32[2,9,128], index: 0, kind: input, shape index: {}]   ;;  %s1075_s1 = inlined_call_operand.vmem [shape: f32[56,48], index: 1, kind: input, shape index: {}]   ;;  %s1076_s2 = inlined_call_operand.vmem [shape: f32[56,1], index: 2, kind: input, shape index: {}]   ;;  %s1077_s3 = inlined_call_operand.vmem [shape: f32[2,2,128], index: 3, kind: output, shape index: {}]  }
   0x1 LB: > { %s792_s13 = sadd.s32 4294967295, %s953_s12   ;;  %p796_p0 = scmp.ge.s32.totalorder %s953_s12, 1  ;;  %s953_s12 = sphi %s984_s12, %s13_s12  }
   0x2   : > { %p137_p1 = scmp.lt.s32.totalorder %s953_s12, 3 }
   0x4   : > { %p138_p2 = pnand %p796_p0, %p137_p1 }
   0x5   : > { %p160_p3 = scmp.lt.s32.totalorder (!%p138_p2), %s792_s13, 1  ;;  %v955_v0 = vmov (!%p138_p2), 0.0|0.0   ;;  %vm956_vm0 = vmmov (!%p138_p2), 0   ;;  %v957_v1 = vmov (!%p138_p2), 0.0   ;;  %v958_v2 = vmov (!%p138_p2), 0   ;;  %s960_s22 = smov (!%p138_p2), 100  }
   0x6   : > { %141 = sbr.rel (%p138_p2) target bundleno = 1825 (0x721), region = 32  ;;  %892 = vmatprep.subr.bf16.mxu0 (!%p138_p2), %v955_v0  ;;  %896 = vmatprep.subr.bf16.mxu1 (!%p138_p2), %v955_v0  ;;  %v174_v3 = vld [vmem:[%s1076_s2] sm:$0xf] (!%p138_p2)  ;;  %vm184_vm1 = vcmask (!%p138_p2), 1040384   ;;  %vm959_vm2 = vmmov (!%p138_p2), 1   ;;  %vm180_vm4 = vcmask (!%p138_p2), 72704   ;;  %v169_v34 = vlaneseq (!%p138_p2) }
   0x7   : > { %844 = vmatprep.mubr.msk.f32.mxu0 (!%p138_p2), %vm956_vm0, %v957_v1  ;;  %935 = vset.pattern.permute.xlu0 (!%p138_p2), %v958_v2  ;;  %vm894_vm3 = vmpackc.low (!%p138_p2), %vm184_vm1, %vm959_vm2  ;;  %v171_v7 = vld [vmem:[%s1075_s1] sm:$0xf] (!%p138_p2)  ;;  %s961_s23 = smov (!%p138_p2), 114   ;;  %v271_v14 = vld [vmem:[%s1076_s2 + $0x8] sm:$0xff] (!%p138_p2)  ;;  %vm269_vm6 = vcmask (!%p138_p2), 1043456   ;;  %vm277_vm8 = vcmask (!%p138_p2), 97280  }
   0x8   : > { %177 = vperm.xlu0 (!%p138_p2), %935, %v174_v3   ;;  %851 = vmatprep.mubr.msk.f32.mxu1 (!%p138_p2), %vm956_vm0, %v957_v1  ;;  %vm898_vm7 = vmpackc.low (!%p138_p2), %vm269_vm6, %vm959_vm2  ;;  %v261_v20 = vld [vmem:[%s1075_s1 + $0x8] sm:$0xff] (!%p138_p2)  ;;  %v357_v22 = vld [vmem:[%s1075_s1 + $0x10] sm:$0xff] (!%p138_p2)  ;;  %vm375_vm9 = vcmask (!%p138_p2), 195584   ;;  %v170_v35 = vand.u32 (!%p138_p2), 127, %v169_v34  ;;  %s962_s9 = smov (!%p138_p2), 28   ;;  %s963_s10 = smov (!%p138_p2), 14  }
   0x9   : > { %936 = vset.pattern.permute.xlu1 (!%p138_p2), %v958_v2  ;;  %v364_v28 = vld [vmem:[%s1076_s2 + $0x18] sm:$0xff] (!%p138_p2)  ;;  %v363_v29 = vld [vmem:[%s1076_s2 + $0x10] sm:$0xff] (!%p138_p2)  ;;  %v477_v50 = vld [vmem:[%s1076_s2 + $0x20] sm:$0xff] (!%p138_p2)  ;;  %vm483_vm15 = vcmask (!%p138_p2), 392192  }
   0xa   : > { %v358_v33 = vld [vmem:[%s1075_s1 + $0x18] sm:$0xff] (!%p138_p2)  ;;  %vm463_vm12 = vcmp.lt.s32.totalorder (!%p138_p2), %v170_v35, 28  ;;  %v468_v59 = vld [vmem:[%s1075_s1 + $0x20] sm:$0xff] (!%p138_p2) }
   0xb   : > { %vm906_vm14 = vmpackc.low (!%p138_p2), %vm463_vm12, %vm463_vm12 }
   0xd   : > { %s1079_s13 = smov (!%p160_p3, %s792_s13), 1 }
   0xe   : > { %s815_s16 = sshll.u32 %s1079_s13, 4  ;;  %s799_s25 = sshll.u32 %s1079_s13, 1 }
   0xf   : > { %s164_s19 = scalar_lea.vmem %s1074_s0, %s815_s16  ;;  %s168_s28 = scalar_lea.vmem %s1077_s3, %s799_s25 }
  0x10   : > { %v172_v4 = vld [vmem:[%s164_s19] sm:$0xff]  ;;  %v173_v5 = vld [vmem:[%s164_s19 + $0x8] sm:$0x1] }
  0x11   : > { %v893_v6 = vpack.c.bf16 %v173_v5, %v172_v4  ;;  %v569_v5 = vld [vmem:[%s1076_s2 + $0x28] sm:$0xf] }
  0x13   : > { %895 = vmatpush3.bf16.msk.msra.mxu0 %vm894_vm3, %v893_v6  ;;  %vm560_vm3 = vcmp.lt.s32.totalorder %v170_v35, 56 }
  0x16   : > { %845 = vmatmul.mubr.msk.f32.vlgmr.msra.gmra.mrb[0].mxu0 %vm180_vm4, %v171_v7  ;;  %vm916_vm4 = vmpackc.low %vm959_vm2, %vm560_vm3 }
  0x17   : > { %860 = vmatprep.mubr.msk.f32.mxu0 %vm375_vm9, %v357_v22 }
  0x87   : > { %v178_v8 = vpop.permute.xlu0 %177 }
  0xe9   : > { %v254_v9 = vpop.f32.mrb[0].mxu0 }
  0xea   : > { %v255_v10 = vadd.f32 %v254_v9, %v178_v8  ;;  %v846_v11 = vpop.f32.mrb[1].mxu0  ;;  %v564_v8 = vld [vmem:[%s1075_s1 + $0x28] sm:$0xf] }
  0xec   : > { %v259_v12 = vmul.f32 0.01, %v255_v10  ;;  %vm258_vm5 = vcmp.ge.f32.partialorder %v255_v10, 0.0 }
  0xee   : > { %v260_v13 = vsel %vm258_vm5, %v255_v10, %v259_v12  ;;  %vm658_vm5 = vcmask 31744  }
  0xef   : > { %264 = vrot.lane.b32.xlu1 %v260_v13, %s960_s22  ;;  %262 = vrot.lane.b32.xlu0 %v260_v13, %s961_s23 }
  0xf3   : > { %274 = vperm.xlu1 %936, %v271_v14  }
 0x161   : > { %v263_v15 = vpop.permute.xlu0 %262  ;;  %v265_v17 = vpop.permute.xlu1 %264 }
 0x162   : > { %v267_v16 = vrot.slane %v263_v15, 4  ;;  %v651_v15 = vld [vmem:[%s1075_s1 + $0x30] sm:$0x3] }
 0x164   : > { %v270_v18 = vsel %vm269_vm6, %v260_v13, %v267_v16 }
 0x165   : > { %v897_v19 = vpack.c.bf16 %v265_v17, %v270_v18 }
 0x167   : > { %899 = vmatpush3.bf16.msk.msra.mxu1 %vm898_vm7, %v897_v19 }
 0x168   : > { %904 = vmatprep.subr.bf16.mxu1 %v955_v0 }
 0x16a   : > { %852 = vmatmul.mubr.msk.f32.vlgmr.msra.gmra.mrb[0].mxu1 %vm277_vm8, %v261_v20 }
 0x16b   : > { %875 = vmatprep.mubr.msk.f32.mxu1 %vm956_vm0, %v957_v1 }
 0x172   : > { %v275_v21 = vpop.permute.xlu1 %274 }
 0x23d   : > { %v350_v23 = vpop.f32.mrb[0].mxu1 }
 0x23e   : > { %v351_v24 = vadd.f32 %v350_v23, %v275_v21  ;;  %v853_v25 = vpop.f32.mrb[1].mxu1 }
 0x240   : > { %v355_v26 = vmul.f32 0.01, %v351_v24  ;;  %vm354_vm10 = vcmp.ge.f32.partialorder %v351_v24, 0.0 }
 0x242   : > { %v356_v27 = vsel %vm354_vm10, %v351_v24, %v355_v26 }
 0x243   : > { %361 = vrot.lane.b32.xlu1 %v356_v27, %s960_s22  ;;  %359 = vrot.lane.b32.xlu0 %v356_v27, %s961_s23 }
 0x247   : > { %372 = vperm.xlu1 %936, %v364_v28   ;;  %367 = vperm.xlu0 %935, %v363_v29  }
 0x2b5   : > { %v360_v30 = vpop.permute.xlu0 %359  ;;  %v362_v32 = vpop.permute.xlu1 %361 }
 0x2b6   : > { %v900_v31 = vpack.c.bf16 %v360_v30, %v356_v27 }
 0x2b8   : > { %901 = vmatprep.subr.bf16.mxu0 %v900_v31 }
 0x2b9   : > { %903 = vmatpush3.bf16.msra.mxu0 %v900_v31 }
 0x2ba   : > { %858 = vmatprep.subr.mxu0 %v362_v32 }
 0x2bd   : > { %859 = vmatpush3.msra.mxu0 %v362_v32 }
 0x2be   : > { %861 = vmatmul.mubr.msk.f32.vlgmr.msra.gmra.mrb[2].mxu0 %vm375_vm9, %v358_v33  ;;  %914 = vmatprep.subr.bf16.mxu0 %v955_v0 }
 0x2bf   : > { %884 = vmatprep.mubr.msk.f32.mxu0 %vm956_vm0, %v957_v1 }
 0x2c6   : > { %v373_v36 = vpop.permute.xlu1 %372  ;;  %v368_v38 = vpop.permute.xlu0 %367 }
 0x391   : > { %v862_v37 = vpop.f32.mrb[2].mxu0 }
 0x392   : > { %v454_v39 = vadd.f32 %v862_v37, %v373_v36  ;;  %v448_v40 = vpop.f32.mrb[3].mxu0 }
 0x393   : > { %v449_v41 = vadd.f32 %v448_v40, %v368_v38 }
 0x394   : > { %vm458_vm11 = vcmp.ge.f32.partialorder %v454_v39, 0.0  ;;  %v460_v42 = vmul.f32 0.01, %v454_v39 }
 0x395   : > { %vm457_vm13 = vcmp.ge.f32.partialorder %v449_v41, 0.0  ;;  %v459_v43 = vmul.f32 0.01, %v449_v41 }
 0x396   : > { %v462_v44 = vsel %vm458_vm11, %v454_v39, %v460_v42 }
 0x397   : > { %v461_v45 = vsel %vm457_vm13, %v449_v41, %v459_v43  ;;  %v467_v46 = vsel %vm463_vm12, %v462_v44, 0.0 }
 0x398   : > { %v905_v47 = vpack.c.bf16 %v462_v44, %v461_v45  ;;  %v466_v48 = vsel %vm463_vm12, %v461_v45, 0.0 }
 0x399   : > { %v942_v49 = vpack.i.bf16 %v467_v46, %v466_v48 }
 0x39a   : > { %907 = vmatpush3.bf16.msk.msra.mxu1 %vm906_vm14, %v905_v47 }
 0x39b   : > { %943 = vrot.lane.b32.xlu1 %v942_v49, %s962_s9  ;;  %938 = vrot.lane.b32.xlu0 %v942_v49, %s963_s10 }
 0x39c   : > { %908 = vmatprep.subr.bf16.mxu1 %v955_v0 }
 0x39f   : > { %480 = vperm.xlu0 %935, %v477_v50  }
 0x40d   : > { %v944_v51 = vpop.permute.xlu1 %943  ;;  %v939_v52 = vpop.permute.xlu0 %938 }
 0x40e   : > { %v941_v53 = vunpack.i.h.bf16 %v939_v52  ;;  %v940_v54 = vunpack.i.l.bf16 %v939_v52  ;;  %v946_v55 = vunpack.i.h.bf16 %v944_v51  ;;  %v945_v56 = vunpack.i.l.bf16 %v944_v51 }
 0x410   : > { %v909_v57 = vpack.c.bf16 %v941_v53, %v940_v54  ;;  %v912_v58 = vpack.c.bf16 %v946_v55, %v945_v56 }
 0x412   : > { %910 = vmatpush3.bf16.msra.mxu1 %v909_v57 }
 0x413   : > { %911 = vmatprep.subr.bf16.mxu1 %v955_v0  ;;  %v652_v0 = vld [vmem:[%s1076_s2 + $0x30] sm:$0x3] }
 0x416   : > { %913 = vmatpush3.bf16.msra.mxu1 %v912_v58 }
 0x419   : > { %876 = vmatmul.mubr.msk.f32.vlgmr.msra.gmra.mrb[2].mxu1 %vm483_vm15, %v468_v59 }
 0x41e   : > { %v481_v60 = vpop.permute.xlu0 %480 }
 0x4ec   : > { %v553_v61 = vpop.f32.mrb[2].mxu1 }
 0x4ed   : > { %v554_v62 = vadd.f32 %v553_v61, %v481_v60  ;;  %v877_v63 = vpop.f32.mrb[3].mxu1 }
 0x4ef   : > { %v558_v2 = vmul.f32 0.01, %v554_v62  ;;  %vm557_vm1 = vcmp.ge.f32.partialorder %v554_v62, 0.0 }
 0x4f1   : > { %v559_v3 = vsel %vm557_vm1, %v554_v62, %v558_v2 }
 0x4f2   : > { %v563_v4 = vsel %vm560_vm3, %v559_v3, 0.0 }
 0x4f3   : > { %567 = vrot.lane.b32.xlu0 %v563_v4, %s962_s9  ;;  %565 = vrot.lane.b32.xlu1 %v563_v4, %s963_s10 }
 0x4f7   : > { %655 = vperm.xlu0 %935, %v652_v0   ;;  %572 = vperm.xlu1 %936, %v569_v5  }
 0x565   : > { %v566_v6 = vpop.permute.xlu1 %565  ;;  %v568_v9 = vpop.permute.xlu0 %567 }
 0x566   : > { %v915_v7 = vpack.c.bf16 %v566_v6, %v559_v3 }
 0x568   : > { %917 = vmatpush3.bf16.msk.msra.mxu0 %vm916_vm4, %v915_v7 }
 0x569   : > { %882 = vmatprep.subr.mxu0 %v957_v1 }
 0x56c   : > { %883 = vmatpush3.msra.mxu0 %v568_v9 }
 0x56d   : > { %885 = vmatmul.mubr.msk.f32.vlgmr.msra.gmra.mrb[4].mxu0 %vm375_vm9, %v564_v8  ;;  %887 = vmatprep.subr.mxu0 %v957_v1 }
 0x56e   : > { %889 = vmatprep.mubr.msk.f32.mxu0 %vm956_vm0, %v957_v1 }
 0x576   : > { %v573_v10 = vpop.permute.xlu1 %572  ;;  %v656_v17 = vpop.permute.xlu0 %655 }
 0x640   : > { %v644_v11 = vpop.f32.mrb[4].mxu0 }
 0x641   : > { %v645_v12 = vadd.f32 %v644_v11, %v573_v10  ;;  %v886_v13 = vpop.f32.mrb[5].mxu0 }
 0x643   : > { %vm648_vm2 = vcmp.ge.f32.partialorder %v645_v12, 0.0  ;;  %v649_v14 = vmul.f32 0.01, %v645_v12 }
 0x645   : > { %v650_v16 = vsel %vm648_vm2, %v645_v12, %v649_v14 }
 0x646   : > { %888 = vmatpush3.msk.msra.mxu0 %vm269_vm6, %v650_v16 }
 0x647   : > { %890 = vmatmul.mubr.msk.f32.vlgmr.msra.gmra.mrb[6].mxu0 %vm658_vm5, %v651_v15 }
 0x71a   : > { %v731_v18 = vpop.f32.mrb[6].mxu0 }
 0x71b   : > { %v732_v19 = vadd.f32 %v731_v18, %v656_v17  ;;  %v891_v1 = vpop.f32.mrb[7].mxu0 }
 0x71d   : > { %vm735_vm0 = vcmp.ge.f32.partialorder %v732_v19, 0.0  ;;  %v736_v20 = vmul.f32 0.01, %v732_v19 }
 0x71f   : > { %v737_v21 = vsel %vm735_vm0, %v732_v19, %v736_v20 }
 0x720   : > { %738 = vst [vmem:[%s168_s28] sm:$0x3] %v737_v21 }
 0x721 PF: > { %s13_s12 = sadd.s32 1, %s953_s12  }
 0x722   : > { %p10_p4 = scmp.ge.s32.totalorder %s13_s12, 4  }
 0x724   :  { %12 = sbr.rel (!%p10_p4) target bundleno = 1 (0x1), region = 62 }

</bundles_post_ra>
